<compile_context>
chip_gen: v5e
topology: v5e:2x2
jax: 0.10.0
libtpu: 0.0.40
codegen_flags: <defaults>
</compile_context>

<pallas_src>
import jax
import jax.numpy as jnp
from jax.experimental import pallas as pl
from jax.experimental.pallas import tpu as pltpu


def _avgpool_kernel(x_ref, a_ref, b_ref, o_ref):
    """One grid step: pool a (b_nc, H_t, W) slab of channel slices.

    x_ref: (b_nc, H_t, W)   input channel rows
    a_ref: (oH_t, H_t)      row-pool matrix, f32, 1/scale**2 folded in
    b_ref: (W, oW)          column-pool 0/1 block-sum matrix, x.dtype
    o_ref: (b_nc, oH_t*oW)  or (b_nc, oH_t, oW)
    """
    b_nc, h_t, w = x_ref.shape
    oh_t = a_ref.shape[0]
    ow = b_ref.shape[1]

    # Column pool as ONE big MXU matmul: M = b_nc*H_t (large), K = W, N = oW.
    # (Reshape is layout-free when H_t % 8 == 0, which holds for scale >= 8.)
    x2d = x_ref[...].reshape(b_nc * h_t, w)
    t = jnp.dot(x2d, b_ref[...], preferred_element_type=jnp.float32)  # (b_nc*H_t, oW) f32
    t3 = t.reshape(b_nc, h_t, ow)

    # Row pool (+ the single 1/scale^2 factor) on the scale x smaller
    # intermediate, fully in f32, as one batched matmul.
    a_b = jnp.broadcast_to(a_ref[...][None], (b_nc, oh_t, h_t))
    y = jnp.einsum("bph,bhw->bpw", a_b, t3,
                   preferred_element_type=jnp.float32)                # (b_nc, oH_t, oW)

    # Single store per grid step (lane-dense slab when o_ref is 2-D).
    o_ref[...] = y.reshape(o_ref.shape).astype(o_ref.dtype)


def _vmem_budget():
    """Per-input-block byte target and scoped VMEM limit, per TPU generation."""
    mib = 1024 * 1024
    vmem_cap = None
    try:
        vmem_cap = int(pltpu.get_tpu_info().vmem_capacity_bytes)
    except Exception:  # best effort; fall through to conservative defaults
        pass
    if vmem_cap is not None and vmem_cap >= 96 * mib:
        # v5e / v6e class: 128 MiB physical VMEM per TensorCore.
        return 16 * mib, 64 * mib
    # v7x class (64 MiB per TensorCore) or unknown: stay conservative.
    return 10 * mib, 44 * mib


def _choose_tiling(nc, h, w, scale, itemsize, target_bytes):
    """Pick (b_nc, h_t): channel-batch size and H-tile size.

    If one channel slice fits the budget: largest divisor of `nc` under the
    budget (mildly preferring >= 2 grid steps so both v7x TensorCores get
    work, but only if that costs at most ~2x block size).  Otherwise b_nc = 1
    and H is tiled in multiples of `scale`, preferring oH tiles that are
    multiples of 8 sublanes.
    """
    ch_bytes = h * w * itemsize
    if ch_bytes <= target_bytes:
        cap = max(1, target_bytes // ch_bytes)
        divisors = [d for d in range(1, nc + 1) if nc % d == 0 and d <= cap]
        b_nc = max(divisors)
        if nc // b_nc < 2:
            alt = [d for d in divisors if nc // d >= 2 and 2 * d >= b_nc]
            if alt:
                b_nc = max(alt)
        return b_nc, h

    # A single channel slice exceeds the budget: tile along H.
    oh = h // scale
    cap_rows = max(scale, target_bytes // max(1, w * itemsize))
    ks = [k for k in range(1, oh + 1) if oh % k == 0 and k * scale <= cap_rows]
    if not ks:
        ks = [1]
    ks8 = [k for k in ks if k % 8 == 0]
    k = max(ks8) if ks8 else max(ks)
    return 1, k * scale


def encoder_forward(x: jax.Array, scale: int = 16) -> jax.Array:
    """Equivalent of Encoder(in_c, out_c, scale).forward(x) for NCHW input."""
    N, C, H, W = x.shape
    # TODO(synk): PyTorch avg_pool2d floors non-divisible spatial dims; here we
    # require divisibility instead of emulating the truncation.
    assert H % scale == 0 and W % scale == 0, "spatial dims must divide scale"
    oH, oW = H // scale, W // scale
    NC = N * C

    # Column-pool matrix B: pure 0/1 block-sum in the input dtype (exact), so
    # the big matmul runs at native MXU rate and accumulates exact sums in f32.
    col_ids = jnp.arange(W) // scale
    b = (col_ids[:, None] == jnp.arange(oW)[None, :]).astype(x.dtype)        # (W, oW)
    # Row-pool matrix A: indicator scaled by the full 1/scale**2, kept in f32
    # so the divide happens once, in f32 (sum-then-divide like PyTorch).
    row_ids = jnp.arange(H) // scale
    a = ((jnp.arange(oH)[:, None] == row_ids[None, :]).astype(jnp.float32)
         * jnp.float32(1.0 / (scale * scale)))                               # (oH, H)

    x_flat = x.reshape(NC, H, W)

    target_bytes, vmem_limit = _vmem_budget()
    b_nc, h_t = _choose_tiling(NC, H, W, scale, x.dtype.itemsize, target_bytes)
    oh_t = h_t // scale
    grid = (NC // b_nc, H // h_t)

    # Lane-dense flattened output slab when the block shape satisfies the
    # (8, 128)/full-dim tiling rule; otherwise fall back to a 3-D output whose
    # trailing block dims equal the full (oH_t, oW) extents.
    flat_out = (h_t == H) and (b_nc % 8 == 0 or b_nc == NC)
    if flat_out:
        out_shape = jax.ShapeDtypeStruct((NC, oH * oW), x.dtype)
        out_specs = pl.BlockSpec((b_nc, oH * oW), lambda i, j: (i, 0))
    else:
        out_shape = jax.ShapeDtypeStruct((NC, oH, oW), x.dtype)
        out_specs = pl.BlockSpec((b_nc, oh_t, oW), lambda i, j: (i, j, 0))

    out = pl.pallas_call(
        _avgpool_kernel,
        out_shape=out_shape,
        grid_spec=pltpu.PrefetchScalarGridSpec(
            num_scalar_prefetch=0,
            grid=grid,
            in_specs=[
                pl.BlockSpec((b_nc, h_t, W), lambda i, j: (i, j, 0)),
                # A tiles block-diagonally with H; constant (0, 0) when
                # h_t == H, so it stays resident in VMEM across steps.
                pl.BlockSpec((oh_t, h_t), lambda i, j: (j, j)),
                pl.BlockSpec((W, oW), lambda i, j: (0, 0)),
            ],
            out_specs=out_specs,
        ),
        compiler_params=pltpu.CompilerParams(
            dimension_semantics=("parallel", "parallel"),
            vmem_limit_bytes=vmem_limit,
        ),
    )(x_flat, a, b)

    return out.reshape(N, C, oH, oW)


if __name__ == "__main__":
    key = jax.random.PRNGKey(0)
    # scale=16 -> spatial must be a multiple of 16; 32x32 pools to 2x2.
    N, C, H, W = 2, 4, 32, 32
    scale = 16
    x = jax.random.normal(key, (N, C, H, W), dtype=jnp.float32)

    out = jax.block_until_ready(encoder_forward(x, scale=scale))

    # Reference: mean over non-overlapping scale x scale windows.
    ref = x.reshape(N, C, H // scale, scale, W // scale, scale).mean(axis=(3, 5))
    assert out.shape == (N, C, H // scale, W // scale)
    assert jnp.allclose(out, ref, atol=1e-5, rtol=1e-5)

    print("KERNEL_OK")
</pallas_src>

<mosaic_0001>
module attributes {stable_mosaic.version = 11 : i64} {
  func.func @_avgpool_kernel(%arg0: i32, %arg1: i32, %arg2: memref<4x32x32xf32, #tpu.memory_space<vmem>>, %arg3: memref<2x32xf32, #tpu.memory_space<vmem>>, %arg4: memref<32x2xf32, #tpu.memory_space<vmem>>, %arg5: memref<4x2x2xf32, #tpu.memory_space<vmem>>) attributes {dimension_semantics = [#tpu.dimension_semantics<parallel>, #tpu.dimension_semantics<parallel>], iteration_bounds = array<i64: 2, 1>, scalar_prefetch = 0 : i64, scratch_operands = 0 : i64, tpu.core_type = #tpu.core_type<tc>, window_params = [{transform_indices = @transform_0, window_bounds = array<i64: 4, 32, 32>}, {transform_indices = @transform_1, window_bounds = array<i64: 2, 32>}, {pipeline_mode = #tpu.pipeline_mode<synchronous>, transform_indices = @transform_2, window_bounds = array<i64: 32, 2>}, {transform_indices = @transform_3, window_bounds = array<i64: 4, 2, 2>}]} {
    %c0 = arith.constant 0 : index
    %c0_0 = arith.constant 0 : index
    %c0_1 = arith.constant 0 : index
    %0 = vector.load %arg2[%c0, %c0_0, %c0_1] : memref<4x32x32xf32, #tpu.memory_space<vmem>>, vector<4x32x32xf32>
    %1 = vector.shape_cast %0 : vector<4x32x32xf32> to vector<128x32xf32>
    %c0_2 = arith.constant 0 : index
    %c0_3 = arith.constant 0 : index
    %2 = vector.load %arg4[%c0_2, %c0_3] : memref<32x2xf32, #tpu.memory_space<vmem>>, vector<32x2xf32>
    %cst = arith.constant dense<0.000000e+00> : vector<128x2xf32>
    %3 = tpu.matmul %1, %2, %cst {dimension_numbers = #tpu.dot_dimension_numbers<[1], [0], [0], [1], [0, 0, 1, 1], [], []>} : vector<128x32xf32>, vector<32x2xf32>, vector<128x2xf32> -> vector<128x2xf32>
    %4 = vector.shape_cast %3 : vector<128x2xf32> to vector<4x32x2xf32>
    %c0_4 = arith.constant 0 : index
    %c0_5 = arith.constant 0 : index
    %5 = vector.load %arg3[%c0_4, %c0_5] : memref<2x32xf32, #tpu.memory_space<vmem>>, vector<2x32xf32>
    %6 = vector.shape_cast %5 : vector<2x32xf32> to vector<1x2x32xf32>
    %7 = vector.shape_cast %6 : vector<1x2x32xf32> to vector<1x2x32xf32>
    %8 = vector.broadcast %7 : vector<1x2x32xf32> to vector<4x2x32xf32>
    "tpu.trace_start"() <{level = 10 : i32, message = "bph,bhw->bpw"}> : () -> ()
    %cst_6 = arith.constant dense<0.000000e+00> : vector<4x2x2xf32>
    %9 = tpu.matmul %8, %4, %cst_6 {dimension_numbers = #tpu.dot_dimension_numbers<[2], [1], [1], [2], [0, 0, 0, 1, 1, 2], [0], [0]>} : vector<4x2x32xf32>, vector<4x32x2xf32>, vector<4x2x2xf32> -> vector<4x2x2xf32>
    "tpu.trace_stop"() : () -> ()
    %c0_7 = arith.constant 0 : index
    %c0_8 = arith.constant 0 : index
    %c0_9 = arith.constant 0 : index
    %10 = vector.load %arg5[%c0_7, %c0_8, %c0_9] : memref<4x2x2xf32, #tpu.memory_space<vmem>>, vector<4x2x2xf32>
    tpu.vector_store %arg5[%c0_7, %c0_8, %c0_9], %9 {strides = array<i32>} : memref<4x2x2xf32, #tpu.memory_space<vmem>>, vector<4x2x2xf32>,
    return
  }
  func.func @transform_0(%arg0: i32, %arg1: i32) -> (i32, i32, i32) {
    %c0_i32 = arith.constant 0 : i32
    %c0_i32_0 = arith.constant 0 : i32
    return %arg0, %arg1, %c0_i32 : i32, i32, i32
  }
  func.func @transform_1(%arg0: i32, %arg1: i32) -> (i32, i32) {
    %c0_i32 = arith.constant 0 : i32
    return %arg1, %arg1 : i32, i32
  }
  func.func @transform_2(%arg0: i32, %arg1: i32) -> (i32, i32) {
    %c0_i32 = arith.constant 0 : i32
    %c0_i32_0 = arith.constant 0 : i32
    %c0_i32_1 = arith.constant 0 : i32
    return %c0_i32, %c0_i32_0 : i32, i32
  }
  func.func @transform_3(%arg0: i32, %arg1: i32) -> (i32, i32, i32) {
    %c0_i32 = arith.constant 0 : i32
    %c0_i32_0 = arith.constant 0 : i32
    return %arg0, %arg1, %c0_i32 : i32, i32, i32
  }
}

</mosaic_0001>

<bundles_post_ra>
// kernel: tpu_custom_call.1
= control target key start
LH: loop header
LB: loop body
LE: loop exit
PB: predicated region body
PF: predicated region fallthrough
CT: control target
= control target key end

     0   :  { %8 = vsyncpa [#allocation3], 0  ;;  %s929_s0 = inlined_call_operand.hbm [shape: f32[8,32,32], index: 0, kind: input, shape index: {}]   ;;  %s930_s1 = inlined_call_operand.vmem [shape: f32[2,32], index: 1, kind: input, shape index: {}]   ;;  %s931_s2 = inlined_call_operand.vmem [shape: f32[32,2], index: 2, kind: input, shape index: {}]   ;;  %s932_s3 = inlined_call_operand.vmem [shape: f32[8,2,2], index: 3, kind: output, shape index: {}]  }
   0x1   :  { %10 = vsyncpa [#allocation3 + $0x1], 0  ;;  %s789_s12 = smov 0   ;;  %s791_s13 = smov 0  }
   0x2   :  { %s793_s14 = smov 0   ;;  %s795_s15 = smov 0  }
   0x3   :  { %s797_s16 = smov 0   ;;  %s799_s17 = smov 0  }
   0x4 LB: > { %s579_s18 = sadd.s32 4294967295, %s765_s17   ;;  %s28_s19 = sadd.s32 1, %s761_s16  ;;  %s765_s17 = sphi %s799_s17, %s16_s17   ;;  %s761_s16 = sphi %s797_s16, %s939_s16   ;;  %s757_s15 = sphi %s795_s15, %s938_s15   ;;  %s753_s14 = sphi %s793_s14, %s937_s14   ;;  %s749_s13 = sphi %s791_s13, %s936_s13   ;;  %s745_s12 = sphi %s789_s12, %s935_s12  }
   0x5   : > { %p30_p0 = scmp.ge.s32.totalorder %s28_s19, 2  ;;  %s37_s20 = sadd.s32 1, %s753_s14 }
   0x6   : > { %p44_p1 = scmp.ne.s32.totalorder %s753_s14, %s749_s13  ;;  %p45_p2 = scmp.eq.s32.totalorder %s765_s17, 0 }
   0x7   : > { %s941_s19 = smov (%p30_p0, %s28_s19), 0  ;;  %p50_p4 = scmp.ne.s32.totalorder %s749_s13, %s745_s12 }
   0x8   : > { %p825_p3 = por %p45_p2, %p44_p1  ;;  %s32_s22 = ssub.s32 %s761_s16, %s941_s19 }
   0x9   : > { %p51_p5 = scmp.eq.s32.totalorder %s579_s18, 0  ;;  %p35_p6 = scmp.eq.s32.totalorder %s32_s22, 0 }
   0xa   : > { %p634_p8 = scmp.lt.s32.totalorder %s765_s17, 2  ;;  %s164_s25 = sand.u32 1, %s753_s14  }
   0xb   : > { %p832_p7 = por %p51_p5, %p50_p4  ;;  %s615_s26 = sshll.u32 %s761_s16, 7 }
   0xc   : > { %s838_s24 = scalar_select %p35_p6, %s753_s14, %s37_s20  }
   0xd   : > { %s584_s27 = sshll.u32 %s164_s25, 7  ;;  %s176_s30 = scalar_lea.hbm %s929_s0, %s615_s26 }
   0xe   : > { %s177_s4 = sshll.u32 %s176_s30, 4  ;;  %s168_s5 = scalar_lea.vmem [#allocation2], %s584_s27  ;;  %s178_s4 = int_to_ptr.hbm [resolvable:$true] %s177_s4 }
   0xf   : > { %s179_s6 = sshll.u32 %s168_s5, 4  ;;  %p631_p9 = pnand %p634_p8, %p825_p3  ;;  %s180_s6 = int_to_ptr.vmem [resolvable:$true] %s179_s6 }
  0x10   : > { %p588_p10 = scmp.ge.s32.totalorder %s765_s17, 1  ;;  %p187_p11 = scmp.lt.s32.totalorder %s765_s17, 3 }
  0x11   : > { %s165_s7 = scalar_lea.sflag [#allocation3], %s164_s25  ;;  %s767_s8 = smov 128  }
  0x12   : > { %s768_s9 = smov 8   ;;  %p188_p12 = pnand %p588_p10, %p187_p11 }
  0x13   : > { %633 = dma.hbm_to_vmem [thread:$0]  (!%p631_p9), %s178_s4, 2048, %s180_s6, %s165_s7, %s767_s8, %s767_s8, %s768_s9  }
  0x14   : > { %191 = sbr.rel (%p188_p12) target bundleno = 332 (0x14c), region = 32  ;;  %s193_s10 = sand.u32 (!%p188_p12), 1, %s749_s13  }
  0x15   : > { %s589_s11 = sshll.u32 (!%p188_p12), %s193_s10, 7  ;;  %s194_s12 = scalar_lea.sflag (!%p188_p12), [#allocation3], %s193_s10 }
  0x16   : > { %s850_s18 = scalar_lea.vmem (!%p188_p12), [#allocation2], %s589_s11 }
  0x19   : > { %740 = dma.done.wait (%p832_p7), %s194_s12, 2048  }
  0x1a   : > { %742 = vsyncadd (%p832_p7), %s194_s12, 4294965248  ;;  %v268_v0 = vld [vmem:[%s931_s2 + $0x18] sm:$0xff]  ;;  %v267_v1 = vld [vmem:[%s931_s2 + $0x10] sm:$0xff]  ;;  %vm269_vm0 = vcmask 261120   ;;  %s590_s4 = sshll.u32 %s757_s15, 2  ;;  %vm467_vm1 = vcmask 9216  }
  0x1b   : > { %330 = vmatpush.msra.mxu0 %v268_v0  ;;  %616 = vmatpush.msra.mxu1 %v268_v0  ;;  %v266_v2 = vld [vmem:[%s931_s2 + $0x8] sm:$0xff]  ;;  %v265_v3 = vld [vmem:[%s931_s2] sm:$0xff]  ;;  %v255_v9 = vld [vmem:[%s850_s18 + $0x30] sm:$0xff]  ;;  %p241_p13 = scmp.lt.s32.totalorder %s590_s4, 7 }
  0x1c   : > { %617 = vmatpush.msra.mxu2 %v268_v0  ;;  %618 = vmatpush.msra.mxu3 %v268_v0  ;;  %v249_v4 = vld [vmem:[%s850_s18] sm:$0xff]  ;;  %v254_v5 = vld [vmem:[%s850_s18 + $0x28] sm:$0xff]  ;;  %v251_v12 = vld [vmem:[%s850_s18 + $0x10] sm:$0xff] }
  0x1d   : > { %331 = vmatpush.msra.mxu0 %v267_v1  ;;  %619 = vmatpush.msra.mxu1 %v267_v1  ;;  %v257_v6 = vld [vmem:[%s850_s18 + $0x40] sm:$0xff]  ;;  %v250_v8 = vld [vmem:[%s850_s18 + $0x8] sm:$0xff]  ;;  %v256_v13 = vld [vmem:[%s850_s18 + $0x38] sm:$0xff]  ;;  %s943_s4 = smov (!%p241_p13, %s590_s4), 7 }
  0x1e   : > { %620 = vmatpush.msra.mxu2 %v267_v1  ;;  %621 = vmatpush.msra.mxu3 %v267_v1  ;;  %v261_v7 = vld [vmem:[%s850_s18 + $0x60] sm:$0xff]  ;;  %v258_v10 = vld [vmem:[%s850_s18 + $0x48] sm:$0xff]  ;;  %v259_v14 = vld [vmem:[%s850_s18 + $0x50] sm:$0xff]  ;;  %s591_s5 = sshll.u32 %s943_s4, 1 }
  0x1f   : > { %332 = vmatpush.msra.mxu0 %v266_v2  ;;  %622 = vmatpush.msra.mxu1 %v266_v2  ;;  %v262_v11 = vld [vmem:[%s850_s18 + $0x68] sm:$0xff]  ;;  %v263_v15 = vld [vmem:[%s850_s18 + $0x70] sm:$0xff]  ;;  %v252_v16 = vld [vmem:[%s850_s18 + $0x18] sm:$0xff]  ;;  %s247_s8 = scalar_lea.vmem %s932_s3, %s591_s5 }
  0x20   : > { %623 = vmatpush.msra.mxu2 %v266_v2  ;;  %624 = vmatpush.msra.mxu3 %v266_v2  ;;  %v260_v17 = vld [vmem:[%s850_s18 + $0x58] sm:$0xff]  ;;  %v253_v19 = vld [vmem:[%s850_s18 + $0x20] sm:$0xff] }
  0x21   : > { %333 = vmatpush.msra.mxu0 %v265_v3  ;;  %625 = vmatpush.msra.mxu1 %v265_v3  ;;  %v264_v18 = vld [vmem:[%s850_s18 + $0x78] sm:$0xff]  ;;  %v383_v33 = vld [vmem:[%s930_s1] sm:$0x3] }
  0x22   : > { %626 = vmatpush.msra.mxu2 %v265_v3  ;;  %627 = vmatpush.msra.mxu3 %v265_v3 }
  0x23   : > { %592 = vmatmul.msk.f32.vlgmr.msra.gmra.mxu0 %vm269_vm0, %v249_v4  ;;  %597 = vmatmul.msk.f32.vlgmr.msra.gmra.mxu1 %vm269_vm0, %v254_v5 }
  0x24   : > { %600 = vmatmul.msk.f32.vlgmr.msra.gmra.mxu2 %vm269_vm0, %v257_v6  ;;  %604 = vmatmul.msk.f32.vlgmr.msra.gmra.mxu3 %vm269_vm0, %v261_v7 }
  0x2b   : > { %593 = vmatmul.msk.f32.gmra.mxu0 %vm269_vm0, %v250_v8  ;;  %598 = vmatmul.msk.f32.gmra.mxu1 %vm269_vm0, %v255_v9 }
  0x2c   : > { %601 = vmatmul.msk.f32.gmra.mxu2 %vm269_vm0, %v258_v10  ;;  %605 = vmatmul.msk.f32.gmra.mxu3 %vm269_vm0, %v262_v11 }
  0x33   : > { %594 = vmatmul.msk.f32.gmra.mxu0 %vm269_vm0, %v251_v12  ;;  %599 = vmatmul.msk.f32.gmra.mxu1 %vm269_vm0, %v256_v13 }
  0x34   : > { %602 = vmatmul.msk.f32.gmra.mxu2 %vm269_vm0, %v259_v14  ;;  %606 = vmatmul.msk.f32.gmra.mxu3 %vm269_vm0, %v263_v15 }
  0x3b   : > { %595 = vmatmul.msk.f32.gmra.mxu0 %vm269_vm0, %v252_v16 }
  0x3c   : > { %603 = vmatmul.msk.f32.gmra.mxu2 %vm269_vm0, %v260_v17  ;;  %607 = vmatmul.msk.f32.gmra.mxu3 %vm269_vm0, %v264_v18 }
  0x43   : > { %596 = vmatmul.msk.f32.gmra.mxu0 %vm269_vm0, %v253_v19 }
  0xa0   : > { %v335_v20 = vpop.f32.mrf.mxu0  ;;  %v350_v21 = vpop.f32.mrf.mxu1 }
  0xa7   : > { %v359_v22 = vpop.f32.mrf.mxu2  ;;  %v371_v23 = vpop.f32.mrf.mxu3 }
  0xa8   : > { %v338_v24 = vpop.f32.mrf.mxu0  ;;  %v353_v25 = vpop.f32.mrf.mxu1 }
  0xaf   : > { %v362_v26 = vpop.f32.mrf.mxu2  ;;  %v374_v27 = vpop.f32.mrf.mxu3 }
  0xb0   : > { %v341_v28 = vpop.f32.mrf.mxu0  ;;  %v356_v29 = vpop.f32.mrf.mxu1 }
  0xb1   : > { %419 = vmatpush.msrb.mxu2 %v356_v29 }
  0xb3   : > { %420 = vmatpush.msrb.mxu2 %v353_v25 }
  0xb5   : > { %421 = vmatpush.msrb.mxu2 %v350_v21 }
  0xb7   : > { %v365_v30 = vpop.f32.mrf.mxu2  ;;  %v377_v31 = vpop.f32.mrf.mxu3 }
  0xb8   : > { %v344_v32 = vpop.f32.mrf.mxu0 }
  0xb9   : > { %399 = vmatpush.msrb.mxu1 %v344_v32 }
  0xbb   : > { %400 = vmatpush.msrb.mxu1 %v341_v28 }
  0xbd   : > { %401 = vmatpush.msrb.mxu1 %v338_v24 }
  0xbf   : > { %v368_v34 = vpop.f32.mrf.mxu2  ;;  %v380_v35 = vpop.f32.mrf.mxu3  ;;  %402 = vmatpush.msrb.mxu1 %v335_v20 }
  0xc0   : > { %439 = vmatpush.msrb.mxu3 %v368_v34  ;;  %v347_v36 = vpop.f32.mrf.mxu0  ;;  %608 = vmatmul.msk.f32.vlgmr.msrb.gmra.mxu1 %vm269_vm0, %v383_v33 }
  0xc1   : > { %459 = vmatpush.msra.mxu1 %v380_v35  ;;  %422 = vmatpush.msrb.mxu2 %v347_v36 }
  0xc2   : > { %440 = vmatpush.msrb.mxu3 %v365_v30  ;;  %609 = vmatmul.msk.f32.vlgmr.msrb.gmra.mxu2 %vm269_vm0, %v383_v33 }
  0xc3   : > { %460 = vmatpush.msra.mxu1 %v377_v31 }
  0xc4   : > { %441 = vmatpush.msrb.mxu3 %v362_v26 }
  0xc5   : > { %461 = vmatpush.msra.mxu1 %v374_v27 }
  0xc6   : > { %442 = vmatpush.msrb.mxu3 %v359_v22 }
  0xc7   : > { %462 = vmatpush.msra.mxu1 %v371_v23  ;;  %610 = vmatmul.msk.f32.vlgmr.msrb.gmra.mxu3 %vm269_vm0, %v383_v33 }
  0xc8   : > { %611 = vmatmul.msk.f32.vlgmr.msra.gmra.mxu1 %vm269_vm0, %v383_v33 }
 0x13d   : > { %v404_v37 = vpop.f32.mrf.mxu1 }
 0x13e   : > { %468 = vst.msk [vmem:[%s247_s8] sm:$0x3] %vm467_vm1, %v404_v37 }
 0x145   : > { %v424_v38 = vpop.f32.mrf.mxu2  ;;  %v464_v39 = vpop.f32.mrf.mxu1 }
 0x146   : > { %469 = vst.msk [vmem:[%s247_s8 + $0x2] sm:$0x3] %vm467_vm1, %v424_v38 }
 0x147   : > { %471 = vst.msk [vmem:[%s247_s8 + $0x6] sm:$0x3] %vm467_vm1, %v464_v39 }
 0x14a   : > { %v444_v40 = vpop.f32.mrf.mxu3 }
 0x14b   : > { %470 = vst.msk [vmem:[%s247_s8 + $0x4] sm:$0x3] %vm467_vm1, %v444_v40 }
 0x14c PF: > { %s16_s17 = sadd.s32 1, %s765_s17   ;;  %s935_s12 = smov %s749_s13 }
 0x14d   : > { %p13_p0 = scmp.ge.s32.totalorder %s16_s17, 4   ;;  %s936_s13 = smov %s753_s14 }
 0x14e   : > { %s937_s14 = smov %s838_s24  ;;  %s938_s15 = smov %s761_s16 }
 0x14f   : > { %s939_s16 = smov %s941_s19  ;;  %15 = sbr.rel (!%p13_p0) target bundleno = 4 (0x4), region = 75 }
 0x154   :  { %500 = vsyncpa [#allocation3], 1 }
 0x155   :  { %502 = vsyncpa [#allocation3 + $0x1], 1 }

</bundles_post_ra>
